<compile_context>
chip_gen: v5e
topology: v5e:2x2
jax: 0.10.0
libtpu: 0.0.40
codegen_flags: <defaults>
</compile_context>

<pallas_src>
import jax
import jax.numpy as jnp
from jax.experimental import pallas as pl
from jax.experimental.pallas import tpu as pltpu


def _round_up(x, m):
    return ((x + m - 1) // m) * m


def _choose_tile(dim, align, max_tile):
    """Pick a tile (multiple of `align`, <= max_tile) minimizing the padded
    extent round_up(dim, tile); on ties prefer the largest tile."""
    dim_p = _round_up(dim, align)
    hi = min(_round_up(max_tile, align), dim_p)
    best_t, best_p = align, dim_p
    for t in range(align, hi + 1, align):
        p = _round_up(dim, t)
        if p < best_p or (p == best_p and t > best_t):
            best_t, best_p = t, p
    return best_t


# ----------------------------------------------------------------------------
# Kernels
# ----------------------------------------------------------------------------
def _linear_kernel_f32out(x_ref, w_ref, b_ref, o_ref):
    """f32 output: accumulate straight into the resident output block.
    x:(tm,tk)  w:(tk,tn) -- weight already in (K,N) layout, plain MXU dot."""
    @pl.when(pl.program_id(2) == 0)
    def _():
        # Bias folded into accumulator init — added exactly once per output tile.
        o_ref[...] = jnp.broadcast_to(b_ref[...], o_ref.shape)

    o_ref[...] += jnp.dot(x_ref[...], w_ref[...],
                          preferred_element_type=jnp.float32)


def _linear_kernel_acc(x_ref, w_ref, b_ref, o_ref, acc_ref):
    """Low-precision output: f32 VMEM accumulator, cast+store at the last k."""
    k = pl.program_id(2)

    @pl.when(k == 0)
    def _():
        acc_ref[...] = jnp.broadcast_to(b_ref[...], acc_ref.shape)

    acc_ref[...] += jnp.dot(x_ref[...], w_ref[...],
                            preferred_element_type=jnp.float32)

    @pl.when(k == pl.num_programs(2) - 1)
    def _():
        o_ref[...] = acc_ref[...].astype(o_ref.dtype)


# ----------------------------------------------------------------------------
# One-time parameter preparation (do NOT repeat per forward)
# ----------------------------------------------------------------------------
def linear_prepare(weight, bias, *, tn_max=512, tk_max=512, compute_dtype=None):
    """weight: (out_features, in_features) torch layout; bias: (out_features,).

    Transposes the weight to (K, N) (so the kernel never transposes on the
    XLU), casts it to the MXU compute dtype, and zero-pads weight/bias to the
    chosen tile multiples.  Returns a params dict consumed by linear_forward.
    """
    N, K = weight.shape
    cdt = jnp.dtype(compute_dtype) if compute_dtype is not None else jnp.dtype(weight.dtype)

    tk = _choose_tile(K, 128, tk_max)
    tn = _choose_tile(N, 128, tn_max)
    Kp, Np = _round_up(K, tk), _round_up(N, tn)

    w_kn = jnp.asarray(weight).T.astype(cdt)                     # (K, N)
    if (Kp, Np) != (K, N):
        w_kn = jnp.pad(w_kn, ((0, Kp - K), (0, Np - N)))
    b = jnp.asarray(bias).reshape(1, N).astype(jnp.float32)
    if Np != N:
        b = jnp.pad(b, ((0, 0), (0, Np - N)))

    return dict(w=w_kn, b=b, N=N, K=K, tn=tn, tk=tk, compute_dtype=cdt)


# ----------------------------------------------------------------------------
# Forward
# ----------------------------------------------------------------------------
def linear_forward(x, params, *, tm_max=512):
    """y = x @ W.T + b, with W/b prepared once by linear_prepare."""
    M, K = x.shape
    assert K == params["K"], "in_features mismatch"
    w, b = params["w"], params["b"]
    tn, tk, cdt = params["tn"], params["tk"], params["compute_dtype"]
    N = params["N"]
    Kp, Np = w.shape
    out_dtype = x.dtype

    x_c = x.astype(cdt) if x.dtype != cdt else x

    # bf16 blocks need (16,128) sublane/lane tiling; f32 needs (8,128).
    m_align = 16 if (jnp.dtype(cdt).itemsize < 4
                     or jnp.dtype(out_dtype).itemsize < 4) else 8
    tm = _choose_tile(M, m_align, tm_max)
    Mp = _round_up(M, tm)

    # Keep >= 2 parallel output blocks when possible so both TensorCores
    # (v7x megacore) get work under ("parallel","parallel","arbitrary").
    if (Mp // tm) * (Np // tn) < 2:
        half = tm // 2
        if half >= m_align and half % m_align == 0 and _round_up(M, half) == Mp:
            tm = half

    if (Mp, Kp) != (M, K):
        x_c = jnp.pad(x_c, ((0, Mp - M), (0, Kp - K)))

    grid = (Mp // tm, Np // tn, Kp // tk)

    x_item = jnp.dtype(cdt).itemsize
    out_item = jnp.dtype(out_dtype).itemsize
    use_acc = out_dtype != jnp.float32
    kernel = _linear_kernel_acc if use_acc else _linear_kernel_f32out
    scratch = [pltpu.VMEM((tm, tn), jnp.float32)] if use_acc else []

    # Double-buffered tile footprint; cap at 48 MiB (safe on v7x's 64 MiB,
    # ample for 512-class tiles on v5e/v6e's 128 MiB).
    footprint = 2 * (tm * tk * x_item + tk * tn * x_item + tm * tn * out_item + tn * 4)
    if use_acc:
        footprint += tm * tn * 4
    vmem_limit = int(min(48 * 2**20, max(32 * 2**20, footprint * 3 // 2)))

    cost = pl.CostEstimate(
        flops=2 * M * N * K,
        transcendentals=0,
        bytes_accessed=M * K * x_item + K * N * x_item + M * N * out_item + N * 4,
    )

    out = pl.pallas_call(
        kernel,
        out_shape=jax.ShapeDtypeStruct((Mp, Np), out_dtype),
        grid_spec=pltpu.PrefetchScalarGridSpec(
            num_scalar_prefetch=0,
            grid=grid,
            in_specs=[
                pl.BlockSpec((tm, tk), lambda i, j, k: (i, k)),   # x tile
                pl.BlockSpec((tk, tn), lambda i, j, k: (k, j)),   # W (K,N) tile
                pl.BlockSpec((1, tn), lambda i, j, k: (0, j)),    # bias tile
            ],
            out_specs=pl.BlockSpec((tm, tn), lambda i, j, k: (i, j)),
            scratch_shapes=scratch,
        ),
        compiler_params=pltpu.CompilerParams(
            dimension_semantics=("parallel", "parallel", "arbitrary"),
            vmem_limit_bytes=vmem_limit,
        ),
        cost_estimate=cost,
    )(x_c, w, b)

    if (Mp, Np) != (M, N):
        out = out[:M, :N]
    return out


def init_linear_params(key, in_features, out_features, dtype=jnp.float32):
    """Matches Linear.reset_params: uniform(-w_bound, w_bound) weight, zero bias."""
    w_bound = float(jnp.sqrt(6.0 / (in_features + out_features)))
    weight = jax.random.uniform(
        key, (out_features, in_features), dtype=jnp.float32,
        minval=-w_bound, maxval=w_bound).astype(dtype)
    bias = jnp.zeros((out_features,), dtype=dtype)
    return weight, bias


# TODO(synk): dropout branch of the module (only registered when dropout > 0.0;
# the default constructor makes the forward a pure affine map, implemented above).


if __name__ == "__main__":
    key = jax.random.PRNGKey(0)
    k_x, k_w, k_x2, k_w2, k_b2 = jax.random.split(key, 5)

    # 1) Small shape consistent with the module forward: (batch, in_features).
    batch, in_features, out_features = 8, 32, 16
    x = jax.random.normal(k_x, (batch, in_features), dtype=jnp.float32)
    weight, bias = init_linear_params(k_w, in_features, out_features)
    params = linear_prepare(weight, bias)
    y = jax.block_until_ready(linear_forward(x, params))
    y_ref = x @ weight.T + bias
    assert y.shape == (batch, out_features)
    assert jnp.allclose(y, y_ref, atol=1e-5, rtol=1e-5)

    # 2) Ragged multi-tile shape: exercises M/N/K tiling, bias fold, the
    #    direct-f32 accumulation path, megacore split, and padding/slicing.
    M2, K2, N2 = 300, 384, 272
    x2 = jax.random.normal(k_x2, (M2, K2), dtype=jnp.float32)
    w2, _ = init_linear_params(k_w2, K2, N2)
    b2 = jax.random.normal(k_b2, (N2,), dtype=jnp.float32)     # non-zero bias
    params2 = linear_prepare(w2, b2)
    y2 = jax.block_until_ready(linear_forward(x2, params2))
    y2_ref = x2 @ w2.T + b2
    assert y2.shape == (M2, N2)
    assert jnp.allclose(y2, y2_ref, atol=1e-4, rtol=1e-4)

    # 3) bf16 MXU compute path (f32 in/out, f32 accumulation).
    params2_bf16 = linear_prepare(w2, b2, compute_dtype=jnp.bfloat16)
    y3 = jax.block_until_ready(linear_forward(x2, params2_bf16))
    x2c = x2.astype(jnp.bfloat16).astype(jnp.float32)
    w2c = w2.astype(jnp.bfloat16).astype(jnp.float32)
    y3_ref = x2c @ w2c.T + b2
    assert jnp.allclose(y3, y3_ref, atol=1e-2, rtol=1e-2)

    # 4) Native bf16 inputs/outputs (exercises the f32-scratch + cast kernel).
    x2_bf = x2.astype(jnp.bfloat16)
    w2_bf = w2.astype(jnp.bfloat16)
    params2_native_bf16 = linear_prepare(w2_bf, b2)
    y4 = jax.block_until_ready(linear_forward(x2_bf, params2_native_bf16))
    y4_ref = x2_bf.astype(jnp.float32) @ w2_bf.astype(jnp.float32).T + b2
    assert y4.dtype == jnp.bfloat16
    assert jnp.allclose(y4.astype(jnp.float32), y4_ref, atol=5e-2, rtol=5e-2)

    print("KERNEL_OK")
</pallas_src>

<mosaic_0001>
module attributes {stable_mosaic.version = 11 : i64} {
  func.func @_linear_kernel_f32out(%arg0: i32, %arg1: i32, %arg2: i32, %arg3: memref<8x128xf32, #tpu.memory_space<vmem>>, %arg4: memref<128x128xf32, #tpu.memory_space<vmem>>, %arg5: memref<1x128xf32, #tpu.memory_space<vmem>>, %arg6: memref<8x128xf32, #tpu.memory_space<vmem>>) attributes {dimension_semantics = [#tpu.dimension_semantics<parallel>, #tpu.dimension_semantics<parallel>, #tpu.dimension_semantics<arbitrary>], iteration_bounds = array<i64: 1, 1, 1>, scalar_prefetch = 0 : i64, scratch_operands = 0 : i64, tpu.core_type = #tpu.core_type<tc>, window_params = [{transform_indices = @transform_0, window_bounds = array<i64: 8, 128>}, {transform_indices = @transform_1, window_bounds = array<i64: 128, 128>}, {transform_indices = @transform_2, window_bounds = array<i64: 1, 128>}, {transform_indices = @transform_3, window_bounds = array<i64: 8, 128>}]} {
    %c0_i32 = arith.constant 0 : i32
    %0 = arith.cmpi eq, %arg2, %c0_i32 : i32
    %1 = arith.extui %0 : i1 to i32
    %c0_i32_0 = arith.constant 0 : i32
    %2 = arith.cmpi ne, %1, %c0_i32_0 : i32
    scf.if %2 {
      %c0_8 = arith.constant 0 : index
      %c0_9 = arith.constant 0 : index
      %9 = vector.load %arg5[%c0_8, %c0_9] : memref<1x128xf32, #tpu.memory_space<vmem>>, vector<1x128xf32>
      %10 = vector.shape_cast %9 : vector<1x128xf32> to vector<1x128xf32>
      %11 = vector.broadcast %10 : vector<1x128xf32> to vector<8x128xf32>
      %c0_10 = arith.constant 0 : index
      %c0_11 = arith.constant 0 : index
      %12 = vector.load %arg6[%c0_10, %c0_11] : memref<8x128xf32, #tpu.memory_space<vmem>>, vector<8x128xf32>
      tpu.vector_store %arg6[%c0_10, %c0_11], %11 {strides = array<i32>} : memref<8x128xf32, #tpu.memory_space<vmem>>, vector<8x128xf32>,
    } else {
    }
    %c0 = arith.constant 0 : index
    %c0_1 = arith.constant 0 : index
    %3 = vector.load %arg6[%c0, %c0_1] : memref<8x128xf32, #tpu.memory_space<vmem>>, vector<8x128xf32>
    %c0_2 = arith.constant 0 : index
    %c0_3 = arith.constant 0 : index
    %4 = vector.load %arg3[%c0_2, %c0_3] : memref<8x128xf32, #tpu.memory_space<vmem>>, vector<8x128xf32>
    %c0_4 = arith.constant 0 : index
    %c0_5 = arith.constant 0 : index
    %5 = vector.load %arg4[%c0_4, %c0_5] : memref<128x128xf32, #tpu.memory_space<vmem>>, vector<128x128xf32>
    %cst = arith.constant dense<0.000000e+00> : vector<8x128xf32>
    %6 = tpu.matmul %4, %5, %cst {dimension_numbers = #tpu.dot_dimension_numbers<[1], [0], [0], [1], [0, 0, 1, 1], [], []>} : vector<8x128xf32>, vector<128x128xf32>, vector<8x128xf32> -> vector<8x128xf32>
    %7 = arith.addf %3, %6 : vector<8x128xf32>
    %c0_6 = arith.constant 0 : index
    %c0_7 = arith.constant 0 : index
    %8 = vector.load %arg6[%c0_6, %c0_7] : memref<8x128xf32, #tpu.memory_space<vmem>>, vector<8x128xf32>
    tpu.vector_store %arg6[%c0_6, %c0_7], %7 {strides = array<i32>} : memref<8x128xf32, #tpu.memory_space<vmem>>, vector<8x128xf32>,
    return
  }
  func.func @transform_0(%arg0: i32, %arg1: i32, %arg2: i32) -> (i32, i32) {
    %c0_i32 = arith.constant 0 : i32
    return %arg0, %arg2 : i32, i32
  }
  func.func @transform_1(%arg0: i32, %arg1: i32, %arg2: i32) -> (i32, i32) {
    %c0_i32 = arith.constant 0 : i32
    return %arg2, %arg1 : i32, i32
  }
  func.func @transform_2(%arg0: i32, %arg1: i32, %arg2: i32) -> (i32, i32) {
    %c0_i32 = arith.constant 0 : i32
    %c0_i32_0 = arith.constant 0 : i32
    return %c0_i32, %arg1 : i32, i32
  }
  func.func @transform_3(%arg0: i32, %arg1: i32, %arg2: i32) -> (i32, i32) {
    %c0_i32 = arith.constant 0 : i32
    return %arg0, %arg1 : i32, i32
  }
}

</mosaic_0001>

<bundles_post_ra>
// kernel: tpu_custom_call.1
= control target key start
LH: loop header
LB: loop body
LE: loop exit
PB: predicated region body
PF: predicated region fallthrough
CT: control target
= control target key end

     0   :  { %8 = vsyncpa [#allocation3], 0  ;;  %s233_s0 = inlined_call_operand.hbm [shape: f32[8,128], index: 0, kind: input, shape index: {}]   ;;  %s234_s1 = inlined_call_operand.hbm [shape: f32[128,128], index: 1, kind: input, shape index: {}]   ;;  %s235_s2 = inlined_call_operand.vmem [shape: f32[1,128], index: 2, kind: input, shape index: {}]   ;;  %s236_s3 = inlined_call_operand.hbm [shape: f32[8,128], index: 3, kind: output, shape index: {}]  }
   0x1   :  { %9 = vsyncpa [#allocation6], 0 }
   0x2   :  { %10 = vsyncpa [#allocation4], 0  ;;  %s16_s14 = sshll.u32 %s233_s0, 4  ;;  %s196_s15 = smov [#allocation2]   ;;  %s17_s14 = int_to_ptr.hbm [resolvable:$true] %s16_s14 }
   0x3   :  { %s18_s16 = sshll.u32 %s196_s15, 4  ;;  %s26_s19 = sshll.u32 %s234_s1, 4  ;;  %s19_s16 = int_to_ptr.vmem [resolvable:$true] %s18_s16  ;;  %s27_s19 = int_to_ptr.hbm [resolvable:$true] %s26_s19 }
   0x4   :  { %21 = dma.hbm_to_vmem [thread:$0]  %s17_s14, 128, %s19_s16, [#allocation3]  }
   0x5   :  { %s197_s20 = smov [#allocation5]   ;;  %s198_s22 = smov 128  }
   0x6   :  { %s28_s21 = sshll.u32 %s197_s20, 4  ;;  %s199_s23 = smov 8   ;;  %s29_s21 = int_to_ptr.vmem [resolvable:$true] %s28_s21 }
   0x7   :  { %34 = dma.hbm_to_vmem [thread:$0]  %s27_s19, 2048, %s29_s21, [#allocation6], %s198_s22, %s198_s22, %s199_s23  }
   0x8   :  { %190 = dma.done.wait [#allocation3], 128  }
   0x9   :  { %191 = vsyncadd [#allocation3], 4294967168 }
   0xa   :  { %192 = dma.done.wait [#allocation6], 2048  }
   0xb   :  { %193 = vsyncadd [#allocation6], 4294965248  ;;  %v71_v0 = vld [vmem:[#allocation5 + $0x78] sm:$0xff]  ;;  %v70_v1 = vld [vmem:[#allocation5 + $0x70] sm:$0xff]  ;;  %s200_s24 = smov [#allocation7]   ;;  %s101_s28 = sshll.u32 %s236_s3, 4  ;;  %s102_s28 = int_to_ptr.hbm [resolvable:$true] %s101_s28 }
   0xc   :  { %72 = vmatpush.msra.mxu0 %v71_v0  ;;  %v69_v2 = vld [vmem:[#allocation5 + $0x68] sm:$0xff]  ;;  %v68_v3 = vld [vmem:[#allocation5 + $0x60] sm:$0xff]  ;;  %v67_v4 = vld [vmem:[#allocation5 + $0x58] sm:$0xff]  ;;  %s99_s25 = sshll.u32 %s200_s24, 4  ;;  %s100_s25 = int_to_ptr.vmem [resolvable:$true] %s99_s25 }
   0xd   :  { %v66_v5 = vld [vmem:[#allocation5 + $0x50] sm:$0xff]  ;;  %v65_v6 = vld [vmem:[#allocation5 + $0x48] sm:$0xff]  ;;  %v64_v7 = vld [vmem:[#allocation5 + $0x40] sm:$0xff] }
   0xe   :  { %73 = vmatpush.msra.mxu0 %v70_v1  ;;  %v63_v8 = vld [vmem:[#allocation5 + $0x38] sm:$0xff]  ;;  %v62_v9 = vld [vmem:[#allocation5 + $0x30] sm:$0xff]  ;;  %v61_v10 = vld [vmem:[#allocation5 + $0x28] sm:$0xff] }
   0xf   :  { %v60_v11 = vld [vmem:[#allocation5 + $0x20] sm:$0xff]  ;;  %v59_v12 = vld [vmem:[#allocation5 + $0x18] sm:$0xff]  ;;  %v58_v13 = vld [vmem:[#allocation5 + $0x10] sm:$0xff] }
  0x10   :  { %74 = vmatpush.msra.mxu0 %v69_v2  ;;  %v57_v14 = vld [vmem:[#allocation5 + $0x8] sm:$0xff]  ;;  %v56_v15 = vld [vmem:[#allocation5] sm:$0xff]  ;;  %v55_v16 = vld [vmem:[#allocation2] sm:$0xff] }
  0x11   :  { %v117_v17 = vld [vmem:[%s235_s2] ss:$0 sm:$0xff] }
  0x12   :  { %75 = vmatpush.msra.mxu0 %v68_v3 }
  0x14   :  { %76 = vmatpush.msra.mxu0 %v67_v4 }
  0x16   :  { %77 = vmatpush.msra.mxu0 %v66_v5 }
  0x18   :  { %78 = vmatpush.msra.mxu0 %v65_v6 }
  0x1a   :  { %79 = vmatpush.msra.mxu0 %v64_v7 }
  0x1c   :  { %80 = vmatpush.msra.mxu0 %v63_v8 }
  0x1e   :  { %81 = vmatpush.msra.mxu0 %v62_v9 }
  0x20   :  { %82 = vmatpush.msra.mxu0 %v61_v10 }
  0x22   :  { %83 = vmatpush.msra.mxu0 %v60_v11 }
  0x24   :  { %84 = vmatpush.msra.mxu0 %v59_v12 }
  0x26   :  { %85 = vmatpush.msra.mxu0 %v58_v13 }
  0x28   :  { %86 = vmatpush.msra.mxu0 %v57_v14 }
  0x2a   :  { %87 = vmatpush.msra.mxu0 %v56_v15 }
  0x2b   :  { %88 = vmatmul.f32.vlgmr.msra.gmra.mxu0 %v55_v16 }
  0xa8   :  { %v89_v18 = vpop.f32.mrf.mxu0 }
  0xa9   :  { %v92_v19 = vadd.f32 %v117_v17, %v89_v18 }
  0xab   :  { %93 = vst [vmem:[#allocation7] sm:$0xff] %v92_v19 }
  0xac   :  { %104 = dma.vmem_to_hbm [thread:$0]  %s100_s25, 128, %s102_s28, [#allocation4]  }
  0xad   :  { %194 = dma.done.wait [#allocation4], 128  }
  0xae   :  { %195 = vsyncadd [#allocation4], 4294967168 }
  0xaf   :  { %109 = vsyncpa [#allocation3], 1 }
  0xb0   :  { %110 = vsyncpa [#allocation6], 1 }
  0xb1   :  { %111 = vsyncpa [#allocation4], 1 }

</bundles_post_ra>
